<compile_context>
chip_gen: v7x
topology: tpu7x:2x2x1
jax: 0.10.0
libtpu: 0.0.40
codegen_flags: <defaults>
</compile_context>

<pallas_src>
import math
import functools

import jax
import jax.numpy as jnp
from jax.experimental import pallas as pl
from jax.experimental.pallas import tpu as pltpu


LANE = 128                      # output / proj-weight last dim padded to this
MATMUL_DTYPE = jnp.bfloat16     # MXU operand dtype (f32 accumulation).
                                # Use jnp.float32 for exact parity w/ PyTorch.


# --------------------------------- kernel ------------------------------------

def mha_kernel(scale, num_heads, x_ref, wqkv_ref, wproj_ref, bproj_ref, out_ref):
    """Fused causal multi-head self-attention for ONE batch element.

    x_ref     : (T, C)        activations for this batch element
    wqkv_ref  : (C, 3*H*hd)   stacked Q|K|V weights, columns ordered (qkv, head, dim)
    wproj_ref : (H*hd, Cp)    output projection, lane-padded to Cp
    bproj_ref : (1, Cp)       output projection bias, lane-padded
    out_ref   : (T, Cp)       lane-dense output (padding sliced off by caller)
    """
    T, C = x_ref.shape
    Hhd, Cp = wproj_ref.shape
    H = num_heads
    hd = Hhd // H

    x = x_ref[...]

    # Fused QKV projection: one wide 2-D MXU matmul (N = 3*H*hd).
    qkv = jnp.dot(x.astype(MATMUL_DTYPE), wqkv_ref[...].astype(MATMUL_DTYPE),
                  preferred_element_type=jnp.float32)            # (T, 3*H*hd)

    # Pure layout op: (T, 3*H*hd) -> (3*H, T, hd); then cheap leading-dim slices.
    qkv = jnp.swapaxes(qkv.reshape(T, 3 * H, hd), 0, 1)          # (3H, T, hd)
    q = qkv[0 * H:1 * H]                                         # (H, T, hd)
    k = qkv[1 * H:2 * H]
    v = qkv[2 * H:3 * H]

    # Attention scores for all heads, batched on the MXU.
    s = jnp.einsum('htd,hsd->hts',
                   q.astype(MATMUL_DTYPE), k.astype(MATMUL_DTYPE),
                   preferred_element_type=jnp.float32) * scale   # (H, T, T)

    # Causal mask built in-kernel (no HBM bias tensor). Finite -1e30, not -inf.
    row = jax.lax.broadcasted_iota(jnp.int32, (T, T), 0)
    col = jax.lax.broadcasted_iota(jnp.int32, (T, T), 1)
    s = jnp.where((row >= col)[None], s, -1e30)

    # Numerically stable softmax with exact normalization.
    s = s - jnp.max(s, axis=-1, keepdims=True)
    p = jnp.exp(s)
    p = p / jnp.sum(p, axis=-1, keepdims=True)

    # Weighted values, still head-batched.
    attn = jnp.einsum('hts,hsd->htd',
                      p.astype(MATMUL_DTYPE), v.astype(MATMUL_DTYPE),
                      preferred_element_type=jnp.float32)        # (H, T, hd)

    # Head "concat" is a pure layout op; merge+projection is ONE matmul (K=H*hd).
    attn_m = jnp.swapaxes(attn, 0, 1).reshape(T, Hhd)            # (T, H*hd)
    out = jnp.dot(attn_m.astype(MATMUL_DTYPE), wproj_ref[...].astype(MATMUL_DTYPE),
                  preferred_element_type=jnp.float32) + bproj_ref[...]

    # TODO(synk): dropout p=0.0 -> identity; p>0 would use pltpu.prng_random_bits.
    out_ref[...] = out.astype(out_ref.dtype)


# --------------------------------- wrapper -----------------------------------

@functools.partial(jax.jit, static_argnames=("num_heads",))
def multi_head_attention(x, params, *, num_heads):
    """x: (B, T, n_embed) float32 -> (B, T, n_embed) float32."""
    B, T, C = x.shape
    wqkv, wproj, bproj = params["wqkv"], params["wproj"], params["bproj"]
    Hhd, Cp = wproj.shape
    hd = Hhd // num_heads
    scale = 1.0 / math.sqrt(hd)

    out = pl.pallas_call(
        functools.partial(mha_kernel, scale, num_heads),
        out_shape=jax.ShapeDtypeStruct((B, T, Cp), jnp.float32),
        grid=(B,),
        in_specs=[
            pl.BlockSpec((None, T, C), lambda b: (b, 0, 0)),     # x[b]
            pl.BlockSpec((C, 3 * Hhd), lambda b: (0, 0)),        # stacked QKV weight
            pl.BlockSpec((Hhd, Cp), lambda b: (0, 0)),           # out projection (padded)
            pl.BlockSpec((1, Cp), lambda b: (0, 0)),             # out bias (padded)
        ],
        out_specs=pl.BlockSpec((None, T, Cp), lambda b: (b, 0, 0)),
        # Batch axis is embarrassingly parallel -> shards across both v7x TCs
        # (no effect on single-TC v5e/v6e).
        compiler_params=pltpu.CompilerParams(
            dimension_semantics=("parallel",),
            vmem_limit_bytes=32 * 1024 * 1024,
        ),
    )(x, wqkv, wproj, bproj)

    return out[..., :C]


# ------------------------------ parameter init --------------------------------

def init_params(key, n_embed, num_heads, head_size, lane_pad=LANE):
    """Weights stored as [in, out] so y = x @ W (+ b), matching nn.Linear math."""
    C, H, hd = n_embed, num_heads, head_size
    Cp = ((C + lane_pad - 1) // lane_pad) * lane_pad
    kq, kk, kv, kw, kb = jax.random.split(key, 5)

    def lin(k, fan_in, shape):
        bound = 1.0 / math.sqrt(fan_in)
        return jax.random.uniform(k, shape, jnp.float32, -bound, bound)

    wq = lin(kq, C, (C, H * hd))                 # columns ordered (head, dim)
    wk = lin(kk, C, (C, H * hd))
    wv = lin(kv, C, (C, H * hd))
    wqkv = jnp.concatenate([wq, wk, wv], axis=1)  # (C, 3*H*hd)

    wproj = lin(kw, H * hd, (H * hd, C))          # proj: (H*hd) -> n_embed
    bproj = lin(kb, H * hd, (C,))
    # Lane-pad the projection output dim so kernel stores are 128-lane dense.
    wproj = jnp.pad(wproj, ((0, 0), (0, Cp - C)))
    bproj = jnp.pad(bproj, (0, Cp - C)).reshape(1, Cp)

    return {"wqkv": wqkv, "wproj": wproj, "bproj": bproj}


# ------------------------------ pure-JAX reference -----------------------------

def mha_reference(x, params, num_heads):
    """f32 reference mirroring the PyTorch module (for tolerance check)."""
    B, T, C = x.shape
    Hhd = params["wproj"].shape[0]
    hd = Hhd // num_heads
    wproj = params["wproj"][:, :C]
    bproj = params["bproj"][0, :C]

    qkv = x @ params["wqkv"]                               # (B, T, 3*H*hd)
    q, k, v = jnp.split(qkv, 3, axis=-1)

    def heads(t):
        return t.reshape(B, T, num_heads, hd).transpose(0, 2, 1, 3)  # (B,H,T,hd)

    q, k, v = heads(q), heads(k), heads(v)
    s = jnp.einsum('bhtd,bhsd->bhts', q, k) / math.sqrt(hd)
    mask = jnp.tril(jnp.ones((T, T), bool))
    s = jnp.where(mask, s, -jnp.inf)
    p = jax.nn.softmax(s, axis=-1)
    attn = jnp.einsum('bhts,bhsd->bthd', p, v).reshape(B, T, Hhd)
    return attn @ wproj + bproj


# ----------------------------------- main --------------------------------------

if __name__ == "__main__":
    # config (mirrors the PyTorch module; dropout=0.0 -> Dropout is identity)
    n_embed = 32
    num_heads = 4
    head_size = 8
    block_size = 16          # max sequence length for the causal mask
    B, T = 2, 8              # T <= block_size

    root = jax.random.PRNGKey(0)
    k_params, k_x = jax.random.split(root)
    params = init_params(k_params, n_embed, num_heads, head_size)
    x = jax.random.normal(k_x, (B, T, n_embed), jnp.float32)

    out = multi_head_attention(x, params, num_heads=num_heads)
    jax.block_until_ready(out)

    assert out.shape == (B, T, n_embed)
    assert bool(jnp.all(jnp.isfinite(out)))

    ref = mha_reference(x, params, num_heads)
    # bf16 MXU operands with f32 accumulation vs. the f32 reference.
    assert bool(jnp.allclose(out, ref, atol=5e-2, rtol=5e-2)), \
        float(jnp.max(jnp.abs(out - ref)))

    print("KERNEL_OK")
</pallas_src>

<mosaic_0001>
module attributes {stable_mosaic.version = 11 : i64} {
  func.func @mha_kernel(%arg0: i32, %arg1: memref<1x8x32xf32, #tpu.memory_space<vmem>>, %arg2: memref<32x96xf32, #tpu.memory_space<vmem>>, %arg3: memref<32x128xf32, #tpu.memory_space<vmem>>, %arg4: memref<1x128xf32, #tpu.memory_space<vmem>>, %arg5: memref<1x8x128xf32, #tpu.memory_space<vmem>>) attributes {dimension_semantics = [#tpu.dimension_semantics<parallel>], iteration_bounds = array<i64: 2>, scalar_prefetch = 0 : i64, scratch_operands = 0 : i64, tpu.core_type = #tpu.core_type<tc>, window_params = [{transform_indices = @transform_0, window_bounds = array<i64: 1, 8, 32>}, {pipeline_mode = #tpu.pipeline_mode<synchronous>, transform_indices = @transform_1, window_bounds = array<i64: 32, 96>}, {pipeline_mode = #tpu.pipeline_mode<synchronous>, transform_indices = @transform_2, window_bounds = array<i64: 32, 128>}, {pipeline_mode = #tpu.pipeline_mode<synchronous>, transform_indices = @transform_3, window_bounds = array<i64: 1, 128>}, {transform_indices = @transform_4, window_bounds = array<i64: 1, 8, 128>}]} {
    %c0 = arith.constant 0 : index
    %c0_0 = arith.constant 0 : index
    %c0_1 = arith.constant 0 : index
    %0 = vector.load %arg1[%c0, %c0_0, %c0_1] : memref<1x8x32xf32, #tpu.memory_space<vmem>>, vector<1x8x32xf32>
    %1 = vector.shape_cast %0 : vector<1x8x32xf32> to vector<8x32xf32>
    %2 = arith.truncf %1 : vector<8x32xf32> to vector<8x32xbf16>
    %c0_2 = arith.constant 0 : index
    %c0_3 = arith.constant 0 : index
    %3 = vector.load %arg2[%c0_2, %c0_3] : memref<32x96xf32, #tpu.memory_space<vmem>>, vector<32x96xf32>
    %4 = arith.truncf %3 : vector<32x96xf32> to vector<32x96xbf16>
    %cst = arith.constant dense<0.000000e+00> : vector<8x96xf32>
    %5 = tpu.matmul %2, %4, %cst {dimension_numbers = #tpu.dot_dimension_numbers<[1], [0], [0], [1], [0, 0, 1, 1], [], []>} : vector<8x32xbf16>, vector<32x96xbf16>, vector<8x96xf32> -> vector<8x96xf32>
    %6 = vector.shape_cast %5 : vector<8x96xf32> to vector<8x12x8xf32>
    %7 = tpu.transpose %6, [1, 0, 2] : vector<8x12x8xf32> -> vector<12x8x8xf32>
    %8 = vector.extract_strided_slice %7 {offsets = [0, 0, 0], sizes = [4, 8, 8], strides = [1, 1, 1]} : vector<12x8x8xf32> to vector<4x8x8xf32>
    %9 = vector.extract_strided_slice %7 {offsets = [4, 0, 0], sizes = [4, 8, 8], strides = [1, 1, 1]} : vector<12x8x8xf32> to vector<4x8x8xf32>
    %10 = vector.extract_strided_slice %7 {offsets = [8, 0, 0], sizes = [4, 8, 8], strides = [1, 1, 1]} : vector<12x8x8xf32> to vector<4x8x8xf32>
    %11 = arith.truncf %8 : vector<4x8x8xf32> to vector<4x8x8xbf16>
    %12 = arith.truncf %9 : vector<4x8x8xf32> to vector<4x8x8xbf16>
    "tpu.trace_start"() <{level = 10 : i32, message = "htd,hsd->hts"}> : () -> ()
    %cst_4 = arith.constant dense<0.000000e+00> : vector<4x8x8xf32>
    %13 = tpu.matmul %11, %12, %cst_4 {dimension_numbers = #tpu.dot_dimension_numbers<[2], [2], [1], [1], [0, 0, 0, 1, 1, 1], [0], [0]>} : vector<4x8x8xbf16>, vector<4x8x8xbf16>, vector<4x8x8xf32> -> vector<4x8x8xf32>
    "tpu.trace_stop"() : () -> ()
    %cst_5 = arith.constant 0.353553385 : f32
    %14 = vector.broadcast %cst_5 : f32 to vector<4x8x8xf32>
    %15 = arith.mulf %13, %14 : vector<4x8x8xf32>
    %16 = tpu.iota {dimensions = array<i32: 0>} : vector<8x8xi32>
    %17 = tpu.iota {dimensions = array<i32: 1>} : vector<8x8xi32>
    %18 = arith.cmpi sge, %16, %17 : vector<8x8xi32>
    %19 = vector.shape_cast %18 : vector<8x8xi1> to vector<1x8x8xi1>
    %cst_6 = arith.constant -1.000000e+30 : f32
    %20 = vector.shape_cast %19 : vector<1x8x8xi1> to vector<1x8x8xi1>
    %21 = vector.broadcast %20 : vector<1x8x8xi1> to vector<4x8x8xi1>
    %22 = vector.broadcast %cst_6 : f32 to vector<4x8x8xf32>
    %23 = arith.select %21, %15, %22 : vector<4x8x8xi1>, vector<4x8x8xf32>
    %cst_7 = arith.constant dense<0xFF800000> : vector<4x8xf32>
    %24 = vector.multi_reduction <maximumf>, %23, %cst_7 [2] : vector<4x8x8xf32> to vector<4x8xf32>
    %25 = vector.shape_cast %24 : vector<4x8xf32> to vector<4x8x1xf32>
    %26 = vector.broadcast %25 : vector<4x8x1xf32> to vector<4x8x8xf32>
    %27 = arith.subf %23, %26 : vector<4x8x8xf32>
    %28 = math.exp %27 : vector<4x8x8xf32>
    %cst_8 = arith.constant dense<0.000000e+00> : vector<4x8xf32>
    %29 = vector.multi_reduction <add>, %28, %cst_8 [2] : vector<4x8x8xf32> to vector<4x8xf32>
    %30 = vector.shape_cast %29 : vector<4x8xf32> to vector<4x8x1xf32>
    %31 = vector.broadcast %30 : vector<4x8x1xf32> to vector<4x8x8xf32>
    %32 = arith.divf %28, %31 : vector<4x8x8xf32>
    %33 = arith.truncf %32 : vector<4x8x8xf32> to vector<4x8x8xbf16>
    %34 = arith.truncf %10 : vector<4x8x8xf32> to vector<4x8x8xbf16>
    "tpu.trace_start"() <{level = 10 : i32, message = "hts,hsd->htd"}> : () -> ()
    %cst_9 = arith.constant dense<0.000000e+00> : vector<4x8x8xf32>
    %35 = tpu.matmul %33, %34, %cst_9 {dimension_numbers = #tpu.dot_dimension_numbers<[2], [1], [1], [2], [0, 0, 0, 1, 1, 2], [0], [0]>} : vector<4x8x8xbf16>, vector<4x8x8xbf16>, vector<4x8x8xf32> -> vector<4x8x8xf32>
    "tpu.trace_stop"() : () -> ()
    %36 = tpu.transpose %35, [1, 0, 2] : vector<4x8x8xf32> -> vector<8x4x8xf32>
    %37 = vector.shape_cast %36 : vector<8x4x8xf32> to vector<8x32xf32>
    %38 = arith.truncf %37 : vector<8x32xf32> to vector<8x32xbf16>
    %c0_10 = arith.constant 0 : index
    %c0_11 = arith.constant 0 : index
    %39 = vector.load %arg3[%c0_10, %c0_11] : memref<32x128xf32, #tpu.memory_space<vmem>>, vector<32x128xf32>
    %40 = arith.truncf %39 : vector<32x128xf32> to vector<32x128xbf16>
    %cst_12 = arith.constant dense<0.000000e+00> : vector<8x128xf32>
    %41 = tpu.matmul %38, %40, %cst_12 {dimension_numbers = #tpu.dot_dimension_numbers<[1], [0], [0], [1], [0, 0, 1, 1], [], []>} : vector<8x32xbf16>, vector<32x128xbf16>, vector<8x128xf32> -> vector<8x128xf32>
    %c0_13 = arith.constant 0 : index
    %c0_14 = arith.constant 0 : index
    %42 = vector.load %arg4[%c0_13, %c0_14] : memref<1x128xf32, #tpu.memory_space<vmem>>, vector<1x128xf32>
    %43 = vector.broadcast %42 : vector<1x128xf32> to vector<8x128xf32>
    %44 = arith.addf %41, %43 : vector<8x128xf32>
    %c0_15 = arith.constant 0 : index
    %c0_16 = arith.constant 0 : index
    %c0_17 = arith.constant 0 : index
    %45 = vector.load %arg5[%c0_15, %c0_16, %c0_17] : memref<1x8x128xf32, #tpu.memory_space<vmem>>, vector<1x8x128xf32>
    %46 = vector.shape_cast %45 : vector<1x8x128xf32> to vector<8x128xf32>
    %47 = vector.shape_cast %44 : vector<8x128xf32> to vector<1x8x128xf32>
    tpu.vector_store %arg5[%c0_15, %c0_16, %c0_17], %47 {strides = array<i32>} : memref<1x8x128xf32, #tpu.memory_space<vmem>>, vector<1x8x128xf32>,
    return
  }
  func.func @transform_0(%arg0: i32) -> (i32, i32, i32) {
    %c0_i32 = arith.constant 0 : i32
    %c0_i32_0 = arith.constant 0 : i32
    %c0_i32_1 = arith.constant 0 : i32
    return %arg0, %c0_i32, %c0_i32_0 : i32, i32, i32
  }
  func.func @transform_1(%arg0: i32) -> (i32, i32) {
    %c0_i32 = arith.constant 0 : i32
    %c0_i32_0 = arith.constant 0 : i32
    %c0_i32_1 = arith.constant 0 : i32
    return %c0_i32, %c0_i32_0 : i32, i32
  }
  func.func @transform_2(%arg0: i32) -> (i32, i32) {
    %c0_i32 = arith.constant 0 : i32
    %c0_i32_0 = arith.constant 0 : i32
    %c0_i32_1 = arith.constant 0 : i32
    return %c0_i32, %c0_i32_0 : i32, i32
  }
  func.func @transform_3(%arg0: i32) -> (i32, i32) {
    %c0_i32 = arith.constant 0 : i32
    %c0_i32_0 = arith.constant 0 : i32
    %c0_i32_1 = arith.constant 0 : i32
    return %c0_i32, %c0_i32_0 : i32, i32
  }
  func.func @transform_4(%arg0: i32) -> (i32, i32, i32) {
    %c0_i32 = arith.constant 0 : i32
    %c0_i32_0 = arith.constant 0 : i32
    %c0_i32_1 = arith.constant 0 : i32
    return %arg0, %c0_i32, %c0_i32_0 : i32, i32, i32
  }
}

</mosaic_0001>

<bundles_post_ra>
// kernel: multi_head_attention.1
= control target key start
LH: loop header
LB: loop body
LE: loop exit
PB: predicated region body
PF: predicated region fallthrough
CT: control target
= control target key end

     0   :  { %9 = vsyncpa [#allocation3], 0  ;;  %s2340_s0 = inlined_call_operand.hbm [shape: f32[2,8,32], index: 0, kind: input, shape index: {}]   ;;  %s2341_s1 = inlined_call_operand.hbm [shape: f32[32,96], index: 1, kind: input, shape index: {}]   ;;  %s2342_s2 = inlined_call_operand.hbm [shape: f32[32,128], index: 2, kind: input, shape index: {}]   ;;  %s2343_s3 = inlined_call_operand.vmem [shape: f32[1,128], index: 3, kind: input, shape index: {}]   ;;  %s2344_s4 = inlined_call_operand.hbm [shape: f32[2,8,128], index: 4, kind: output, shape index: {}]  }
   0x1   :  { %11 = vsyncpa [#allocation3 + $0x1], 0 }
   0x2   :  { %12 = vsyncpa [#allocation6], 0 }
   0x3   :  { %13 = vsyncpa [#allocation4], 0 }
   0x4   :  { %15 = vsyncpa [#allocation4 + $0x1], 0  ;;  %s1931_s15 = smov 0   ;;  %s1933_s16 = smov 0  }
   0x5   :  { %s1935_s17 = smov 0   ;;  %s1937_s18 = smov 0  }
   0x6 LB: > { %s1952_s19 = sadd.s32 4294967295, %s1880_s18   ;;  %s1496_s20 = sadd.s32 4294967294, %s1880_s18   ;;  %s1880_s18 = sphi %s1937_s18, %s2364_s18   ;;  %s1876_s17 = sphi %s1935_s17, %s2363_s17   ;;  %s1872_s16 = sphi %s1933_s16, %s2362_s16   ;;  %s1868_s15 = sphi %s1931_s15, %s2361_s15  }
   0x7   : > { %p41_p0 = scmp.ne.s32.totalorder %s1872_s16, %s1868_s15  ;;  %p2345_p1 = scmp.eq.s32.totalorder %s1952_s19, 0 }
   0x8   : > { %p134_p3 = scmp.eq.s32.totalorder %s1496_s20, 1  ;;  %p1497_p5 = scmp.ge.s32.totalorder %s1880_s18, 1 }
   0x9   : > { %p1961_p4 = por %p2345_p1, %p41_p0  ;;  %p141_p7 = scmp.lt.s32.totalorder %s1880_s18, 3 }
   0xa   : > { %p1966_p6 = por %p134_p3, %p41_p0  ;;  %s1882_s24 = smov [#allocation5]  }
   0xb   : > { %s2348_s21 = scalar_select %p1961_p4, 1, 0 }
   0xc   : > { %s2349_s22 = scalar_select %p1966_p6, 1, 0 }
   0xd   : > { %p1971_p8 = pnand %p1497_p5, %p141_p7  ;;  %s153_s25 = sshll.u32 %s1882_s24, 4  ;;  %s1975_s25 = int_to_ptr.vmem [resolvable:$true] %s153_s25 }
   0xe   : > { %s1883_s27 = smov [#allocation7]   ;;  %s1724_s5 = scalar_lea.hbm %s2341_s1, 512 }
   0xf   : > { %p1633_p9 = pneg %p1971_p8  ;;  %s166_s28 = sshll.u32 %s1883_s27, 4  ;;  %s1986_s28 = int_to_ptr.vmem [resolvable:$true] %s166_s28 }
  0x10   : > { %p1725_p12 = scmp.ne.s32.totalorder %s2341_s1, %s1724_s5  ;;  %p1731_p5 = scmp.lt.u32.totalorder %s1724_s5, %s2341_s1 }
  0x11   : > { %p1982_p11 = pnand %p1633_p9, %p2345_p1 }
  0x13   : > { %p1726_p13 = pneg %p1982_p11 }
  0x15   : > { %p1727_p0 = pnand %p1726_p13, %p1725_p12 }
  0x17   : > { %p1728_p3 = pneg %p1727_p0 }
  0x19   : > { %p1733_p7 = pnand %p1731_p5, %p1728_p3 }
  0x1b   : > { %1736 = shalt.err (!%p1733_p7)
}
  0x1c   : > { %s1737_s10 = scalar_lea.vmem %s1975_s25, 512  ;;  %p1745_p2 = scmp.lt.s32.totalorder %s1975_s25, %s1975_s25 }
  0x1d   : > { %p1738_p9 = scmp.ne.s32.totalorder %s1975_s25, %s1737_s10  ;;  %p1746_p12 = scmp.lt.s32.totalorder %s1737_s10, %s1737_s10 }
  0x1f   : > { %p1740_p10 = pnand %p1738_p9, %p1726_p13  ;;  %p1747_p0 = por %p1746_p12, %p1745_p2 }
  0x21   : > { %p1741_p1 = pneg %p1740_p10 }
  0x23   : > { %p1748_p6 = pnand %p1747_p0, %p1741_p1 }
  0x25   : > { %1751 = shalt.err (!%p1748_p6)
}
  0x26   : > { %s1884_s11 = smov 128   ;;  %s1885_s12 = smov 8  }
  0x27   : > { %1636 = dma.hbm_to_vmem [thread:$0]  (!%p1982_p11), %s2341_s1, 512, %s1975_s25, [#allocation6], %s1884_s11, %s1884_s11, %s1885_s12  }
  0x28   : > { %s1752_s27 = scalar_lea.hbm %s2342_s2, 512 }
  0x29   : > { %p1753_p2 = scmp.ne.s32.totalorder %s2342_s2, %s1752_s27  ;;  %p1759_p10 = scmp.lt.u32.totalorder %s1752_s27, %s2342_s2 }
  0x2b   : > { %p1755_p1 = pnand %p1753_p2, %p1726_p13 }
  0x2d   : > { %p1756_p6 = pneg %p1755_p1 }
  0x2f   : > { %p1761_p3 = pnand %p1759_p10, %p1756_p6 }
  0x31   : > { %1764 = shalt.err (!%p1761_p3)
}
  0x32   : > { %s1765_s25 = scalar_lea.vmem %s1986_s28, 512  ;;  %p1773_p12 = scmp.lt.s32.totalorder %s1986_s28, %s1986_s28 }
  0x33   : > { %p1766_p5 = scmp.ne.s32.totalorder %s1986_s28, %s1765_s25  ;;  %p1774_p0 = scmp.lt.s32.totalorder %s1765_s25, %s1765_s25 }
  0x35   : > { %p1768_p7 = pnand %p1766_p5, %p1726_p13  ;;  %p1775_p2 = por %p1774_p0, %p1773_p12 }
  0x37   : > { %p1769_p9 = pneg %p1768_p7 }
  0x39   : > { %p1776_p1 = pnand %p1775_p2, %p1769_p9 }
  0x3b   : > { %1779 = shalt.err (!%p1776_p1)
}
  0x3c   : > { %1639 = dma.hbm_to_vmem [thread:$0]  (!%p1982_p11), %s2342_s2, 512, %s1986_s28, [#allocation6], %s1884_s11, %s1884_s11, %s1885_s12  }
  0x3d   : > { %s2041_s9 = sadd.s32 1, %s1880_s18   ;;  %s28_s26 = sadd.s32 1, %s1876_s17 }
  0x3e   : > { %s25_s10 = ssub.s32 %s1880_s18, %s2041_s9  ;;  %p35_p13 = scmp.ne.s32.totalorder %s1876_s17, %s1872_s16 }
  0x3f   : > { %p26_p6 = scmp.eq.s32.totalorder %s25_s10, 0  ;;  %p36_p10 = scmp.eq.s32.totalorder %s1880_s18, 0 }
  0x40   : > { %p2352_p3 = scmp.eq.s32.totalorder %s1952_s19, 1  ;;  %p1650_p7 = scmp.lt.s32.totalorder %s1880_s18, 2 }
  0x41   : > { %s2057_s14 = scalar_select %p26_p6, %s1876_s17, %s28_s26  }
  0x42   : > { %p2051_p5 = por %p2352_p3, %p35_p13  ;;  %p37_p9 = por %p36_p10, %p35_p13 }
  0x43   : > { %s183_s20 = sand.u32 1, %s1876_s17   ;;  %s1502_s28 = sshll.u32 %s1880_s18, 7 }
  0x44   : > { %s2353_s13 = scalar_select %p2051_p5, 1, 0 }
  0x45   : > { %s1501_s24 = sshll.u32 %s183_s20, 3  ;;  %s2064_s27 = scalar_lea.hbm %s2340_s0, %s1502_s28 }
  0x46   : > { %s187_s29 = scalar_lea.vmem [#allocation2], %s1501_s24  ;;  %p2068_p11 = pnand %p1650_p7, %p37_p9 }
  0x47   : > { %s194_s30 = sshll.u32 %s187_s29, 4  ;;  %s184_s6 = scalar_lea.sflag [#allocation3], %s183_s20  ;;  %s2066_s30 = int_to_ptr.vmem [resolvable:$true] %s194_s30 }
  0x48   : > { %s1780_s25 = scalar_lea.hbm %s2064_s27, 128  ;;  %p1782_p0 = pneg %p2068_p11 }
  0x49   : > { %p1781_p12 = scmp.ne.s32.totalorder %s2064_s27, %s1780_s25  ;;  %s1785_s26 = scalar_lea.hbm %s2340_s0, 256 }
  0x4a   : > { %p1786_p13 = scmp.lt.u32.totalorder %s2064_s27, %s2340_s0  ;;  %p1787_p6 = scmp.lt.u32.totalorder %s1785_s26, %s1780_s25 }
  0x4b   : > { %p1783_p2 = pnand %p1782_p0, %p1781_p12  ;;  %p1789_p3 = scmp.lt.u32.totalorder %s1780_s25, %s2064_s27 }
  0x4c   : > { %p1788_p10 = por %p1787_p6, %p1786_p13 }
  0x4d   : > { %p1784_p1 = pneg %p1783_p2 }
  0x4e   : > { %p1790_p7 = por %p1789_p3, %p1788_p10 }
  0x50   : > { %p1791_p9 = pnand %p1790_p7, %p1784_p1 }
  0x52   : > { %1794 = shalt.err (!%p1791_p9)
}
  0x53   : > { %s1795_s20 = scalar_lea.vmem %s2066_s30, 128  ;;  %s1886_s28 = smov [#allocation2]  }
  0x54   : > { %p1796_p12 = scmp.ne.s32.totalorder %s2066_s30, %s1795_s20  ;;  %s1800_s11 = sshll.u32 %s1886_s28, 4  ;;  %s1801_s11 = int_to_ptr.vmem [resolvable:$false] %s1800_s11 }
  0x55   : > { %s1802_s12 = scalar_lea.vmem %s1801_s11, 256  ;;  %p1803_p4 = scmp.lt.s32.totalorder %s2066_s30, %s1801_s11 }
  0x56   : > { %p1798_p2 = pnand %p1796_p12, %p1782_p0  ;;  %p1804_p13 = scmp.lt.s32.totalorder %s1802_s12, %s1795_s20 }
  0x58   : > { %p1799_p5 = pneg %p1798_p2  ;;  %p1805_p6 = por %p1804_p13, %p1803_p4 }
  0x5a   : > { %p1806_p10 = pnand %p1805_p6, %p1799_p5 }
  0x5c   : > { %1809 = shalt.err (!%p1806_p10)
}
  0x5d   : > { %1643 = dma.hbm_to_vmem [thread:$0]  (!%p2068_p11), %s2064_s27, 128, %s2066_s30, %s184_s6  }
  0x5e   : > { %203 = sbr.rel (%p1971_p8) target bundleno = 1640 (0x668), region = 36  ;;  %s2100_s29 = sand.u32 (!%p1971_p8), 1, %s1872_s16  }
  0x5f   : > { %s1504_s25 = sshll.u32 (!%p1971_p8), %s2100_s29, 3  ;;  %s206_s7 = scalar_lea.sflag (!%p1971_p8), [#allocation3], %s2100_s29 }
  0x60   : > { %s209_s8 = scalar_lea.vmem (!%p1971_p8), [#allocation2], %s1504_s25  ;;  %p2355_p4 = scmp.ne.s32.totalorder (!%p1971_p8), %s2348_s21, 0 }
  0x65   : > { %1855 = dma.done.wait (%p2355_p4), %s206_s7, 128  }
  0x66   : > { %1857 = vsyncadd (%p2355_p4), %s206_s7, 4294967168  ;;  %p2356_p5 = scmp.eq.s32.totalorder %s1952_s19, 0 }
  0x68   : > { %1859 = dma.done.wait (%p2356_p5), [#allocation6], 1024   ;;  %p2357_p8 = pmov %p2356_p5 }
  0x69   : > { %v1887_v0 = vmov 0.0   ;;  %vm1888_vm0 = vmmov 0   ;;  %v245_v1 = vld [vmem:[#allocation5] sm:$0xff]  ;;  %v246_v2 = vld [vmem:[#allocation5 + $0x8] sm:$0xff]  ;;  %v247_v3 = vld [vmem:[#allocation5 + $0x10] sm:$0xff]  ;;  %vm251_vm1 = vcmask 261120   ;;  %v334_v15 = vlaneseq }
  0x6a   : > { %1861 = vsyncadd (%p2357_p8), [#allocation6], 4294966272  ;;  %1557 = vmatprep.subr.bf16.mxu0 %v1887_v0  ;;  %1561 = vmatprep.mubr.msk.bf16.mxu0 %vm1888_vm0, %v1887_v0  ;;  %v249_v4 = vpack.c.bf16 %v246_v2, %v245_v1  ;;  %v248_v5 = vld [vmem:[#allocation5 + $0x18] sm:$0xff]  ;;  %s1889_s21 = smov 80   ;;  %s1890_s23 = smov 96   ;;  %vm745_vm2 = vcmask 64512  }
  0x6b   : > { %1565 = vmatprep.subr.bf16.mxu1 %v1887_v0  ;;  %1567 = vmatprep.mubr.msk.bf16.mxu1 %vm1888_vm0, %v1887_v0  ;;  %v250_v6 = vpack.c.bf16 %v248_v5, %v247_v3  ;;  %v243_v7 = vld [vmem:[%s209_s8] sm:$0xff]  ;;  %s1891_s27 = smov 72   ;;  %s1892_s30 = smov 88   ;;  %v1896_v13 = vmov 1983009808   ;;  %v2135_v19 = vshrl.u32 %v334_v15, 7 }
  0x6c   : > { %1558 = vmatpush3.bf16.msra.mxu0 %v249_v4  ;;  %v244_v8 = vpack.c.bf16 %v243_v7, %v243_v7  ;;  %s1893_s5 = smov 112   ;;  %s1894_s6 = smov 120   ;;  %v332_v14 = vunpack.c.l.s4 %v1896_v13  ;;  %v1897_v16 = vmov 1934713408   ;;  %vm1000_vm4 = vcmask 1043456  }
  0x6d   : > { %1559 = vmatprep.subr.bf16.mxu0 %v1887_v0  ;;  %s1895_s26 = smov 104   ;;  %v396_v17 = vunpack.c.l.s4 %v1897_v16  ;;  %s1898_s10 = smov 56   ;;  %vm1331_vm5 = vcmask 130048   ;;  %vm1333_vm6 = vcmask 195584  }
  0x6e   : > { %v333_v18 = vunpack.c.0.s8 %v332_v14  ;;  %s1899_s24 = smov 64   ;;  %s1900_s20 = smov 48  }
  0x6f   : > { %v397_v22 = vunpack.c.0.s8 %v396_v17  ;;  %s1901_s28 = smov 40   ;;  %s1902_s11 = smov 16  }
  0x70   : > { %1560 = vmatpush3.bf16.msra.mxu0 %v250_v6  ;;  %v2138_v23 = vsub.s32 %v333_v18, %v2135_v19  ;;  %s1903_s12 = smov 8   ;;  %s1904_s7 = smov 24  }
  0x71   : > { %1571 = vmatprep.subr.bf16.mxu0 %v1887_v0  ;;  %v2141_v30 = vsub.s32 %v397_v22, %v2135_v19  ;;  %p2358_p0 = scmp.ne.s32.totalorder %s2353_s13, 0 }
  0x73   : > { %1562 = vmatmul.mubr.msk.bf16.vlgmr.msra.gmra.mrb[0].mxu0 %vm251_vm1, %v244_v8 }
  0x74   : > { %1573 = vmatprep.mubr.msk.bf16.mxu0 %vm1888_vm0, %v1887_v0 }
 0x146   : > { %v2125_v9 = vpop.f32.mrb[0].mxu0 }
 0x147   : > { %311 = vrot.lane.b32.xlu1 %v2125_v9, %s1889_s21  ;;  %305 = vrot.lane.b32.xlu0 %v2125_v9, %s1890_s23  ;;  %v1563_v10 = vpop.f32.mrb[1].mxu0  ;;  %s1532_s23 = sshll.u32 %s1952_s19, 7  ;;  %s1394_s19 = scalar_lea.sflag [#allocation4], %s2100_s29 }
 0x148   : > { %v292_v11 = vpop.f32.mrb[2].mxu0 }
 0x149   : > { %v1564_v12 = vpop.f32.mrb[3].mxu0 }
 0x14b   : > { %314 = vrot.lane.b32.xlu1 %v2125_v9, %s1891_s27  ;;  %308 = vrot.lane.b32.xlu0 %v2125_v9, %s1892_s30  ;;  %s241_s27 = scalar_lea.vmem [#allocation8], %s1504_s25  ;;  %s1905_s25 = smov [#allocation8]  }
 0x14c   : > { %s1407_s30 = sshll.u32 %s241_s27, 4  ;;  %s2298_s30 = int_to_ptr.vmem [resolvable:$true] %s1407_s30 }
 0x14f   : > { %299 = vrot.lane.b32.xlu1 %v2125_v9, %s1893_s5  ;;  %296 = vrot.lane.b32.xlu0 %v2125_v9, %s1894_s6 }
 0x153   : > { %302 = vrot.lane.b32.xlu0 %v2125_v9, %s1895_s26  ;;  %s2296_s26 = scalar_lea.hbm %s2344_s4, %s1532_s23 }
 0x1b9   : > { %v312_v20 = vpop.permute.xlu1 %311  ;;  %v306_v21 = vpop.permute.xlu0 %305 }
 0x1ba   : > { %v361_v24 = vcombine.low %v306_v21, %v312_v20  ;;  %v362_v25 = vcombine.high %v306_v21, %v312_v20 }
 0x1bc   : > { %v369_v31 = vrot.slane %v361_v24, %v2138_v23  ;;  %v376_v32 = vrot.slane %v362_v25, %v2138_v23 }
 0x1bd   : > { %v315_v26 = vpop.permute.xlu1 %314  ;;  %v309_v27 = vpop.permute.xlu0 %308 }
 0x1be   : > { %v377_v28 = vcombine.low %v309_v27, %v315_v26  ;;  %v378_v29 = vcombine.high %v309_v27, %v315_v26 }
 0x1c0   : > { %v385_v33 = vrot.slane %v377_v28, %v2138_v23  ;;  %v392_v34 = vrot.slane %v378_v29, %v2138_v23 }
 0x1c1   : > { %v297_v35 = vpop.permute.xlu0 %296  ;;  %v300_v40 = vpop.permute.xlu1 %299 }
 0x1c2   : > { %v425_v36 = vcombine.low %v369_v31, %v385_v33  ;;  %v426_v37 = vcombine.high %v369_v31, %v385_v33  ;;  %v441_v38 = vcombine.low %v376_v32, %v392_v34  ;;  %v442_v39 = vcombine.high %v376_v32, %v392_v34 }
 0x1c3   : > { %v329_v45 = vcombine.low %v2125_v9, %v300_v40  ;;  %v330_v46 = vcombine.high %v2125_v9, %v300_v40 }
 0x1c4   : > { %v433_v41 = vrot.slane %v425_v36, %v2141_v30  ;;  %v440_v42 = vrot.slane %v426_v37, %v2141_v30  ;;  %v449_v43 = vrot.slane %v441_v38, %v2141_v30  ;;  %v456_v44 = vrot.slane %v442_v39, %v2141_v30 }
 0x1c5   : > { %v303_v47 = vpop.permute.xlu0 %302  ;;  %v337_v58 = vrot.slane %v329_v45, %v2138_v23  ;;  %v344_v59 = vrot.slane %v330_v46, %v2138_v23 }
 0x1c6   : > { %v1510_v48 = vcombine.low %v433_v41, %v440_v42  ;;  %v1512_v49 = vcombine.high %v433_v41, %v440_v42  ;;  %v1514_v50 = vcombine.low %v449_v43, %v456_v44  ;;  %v1516_v51 = vcombine.high %v449_v43, %v456_v44 }
 0x1c7   : > { %v345_v52 = vcombine.low %v297_v35, %v303_v47  ;;  %v346_v53 = vcombine.high %v297_v35, %v303_v47 }
 0x1c8   : > { %v548_v54 = vrot.slane %v1510_v48, %v2138_v23  ;;  %v564_v55 = vrot.slane %v1512_v49, %v2138_v23  ;;  %v580_v56 = vrot.slane %v1514_v50, %v2138_v23  ;;  %v596_v57 = vrot.slane %v1516_v51, %v2138_v23 }
 0x1c9   : > { %v353_v60 = vrot.slane %v345_v52, %v2138_v23  ;;  %v360_v61 = vrot.slane %v346_v53, %v2138_v23 }
 0x1ca   : > { %v613_v62 = vcombine.low %v548_v54, %v564_v55  ;;  %v645_v63 = vcombine.low %v580_v56, %v596_v57  ;;  %v614_v7 = vcombine.high %v548_v54, %v564_v55  ;;  %v646_v8 = vcombine.high %v580_v56, %v596_v57 }
 0x1cb   : > { %v393_v1 = vcombine.low %v337_v58, %v353_v60  ;;  %v394_v2 = vcombine.high %v337_v58, %v353_v60  ;;  %v409_v3 = vcombine.low %v344_v59, %v360_v61  ;;  %v410_v4 = vcombine.high %v344_v59, %v360_v61 }
 0x1cc   : > { %v621_v5 = vrot.slane %v613_v62, %v2141_v30  ;;  %v653_v6 = vrot.slane %v645_v63, %v2141_v30  ;;  %v628_v25 = vrot.slane %v614_v7, %v2141_v30  ;;  %v660_v26 = vrot.slane %v646_v8, %v2141_v30 }
 0x1cd   : > { %v401_v10 = vrot.slane %v393_v1, %v2141_v30  ;;  %v408_v11 = vrot.slane %v394_v2, %v2141_v30  ;;  %v417_v12 = vrot.slane %v409_v3, %v2141_v30  ;;  %v424_v13 = vrot.slane %v410_v4, %v2141_v30 }
 0x1ce   : > { %v665_v14 = vcombine.low %v621_v5, %v653_v6  ;;  %v666_v16 = vcombine.high %v621_v5, %v653_v6  ;;  %v667_v36 = vcombine.low %v628_v25, %v660_v26  ;;  %v668_v37 = vcombine.high %v628_v25, %v660_v26 }
 0x1cf   : > { %v1509_v17 = vcombine.low %v401_v10, %v408_v11  ;;  %v1511_v18 = vcombine.high %v401_v10, %v408_v11  ;;  %v1513_v20 = vcombine.low %v417_v12, %v424_v13  ;;  %v1515_v21 = vcombine.high %v417_v12, %v424_v13 }
 0x1d0   : > { %v741_v22 = vpack.c.bf16 %v665_v14, %v665_v14  ;;  %v742_v24 = vpack.c.bf16 %v666_v16, %v666_v16  ;;  %v743_v44 = vpack.c.bf16 %v667_v36, %v667_v36  ;;  %v744_v45 = vpack.c.bf16 %v668_v37, %v668_v37 }
 0x1d1   : > { %v541_v27 = vrot.slane %v1509_v17, %v2138_v23  ;;  %v557_v28 = vrot.slane %v1511_v18, %v2138_v23  ;;  %v573_v29 = vrot.slane %v1513_v20, %v2138_v23  ;;  %v589_v31 = vrot.slane %v1515_v21, %v2138_v23 }
 0x1d2   : > { %v750_v32 = vsel %vm745_vm2, %v741_v22, 0  ;;  %v796_v33 = vsel %vm745_vm2, %v742_v24, 0  ;;  %v842_v50 = vsel %vm745_vm2, %v743_v44, 0  ;;  %v888_v51 = vsel %vm745_vm2, %v744_v45, 0 }
 0x1d3   : > { %1566 = vmatpush3.bf16.xpose.msra.mxu1 %v750_v32  ;;  %1572 = vmatpush3.bf16.xpose.msra.mxu0 %v796_v33  ;;  %v597_v34 = vcombine.low %v541_v27, %v557_v28  ;;  %v629_v35 = vcombine.low %v573_v29, %v589_v31  ;;  %v598_v39 = vcombine.high %v541_v27, %v557_v28  ;;  %v937_v56 = vand.u32 127, %v334_v15 }
 0x1d4   : > { %1577 = vmatprep.subr.bf16.mxu1 %v1887_v0  ;;  %1583 = vmatprep.subr.bf16.mxu0 %v1887_v0  ;;  %v630_v40 = vcombine.high %v573_v29, %v589_v31 }
 0x1d5   : > { %v605_v38 = vrot.slane %v597_v34, %v2141_v30  ;;  %v637_v41 = vrot.slane %v629_v35, %v2141_v30  ;;  %v612_v48 = vrot.slane %v598_v39, %v2141_v30  ;;  %vm938_vm3 = vcmp.ge.s32.totalorder %v2135_v19, %v937_v56 }
 0x1d6   : > { %v644_v49 = vrot.slane %v630_v40, %v2141_v30 }
 0x1d7   : > { %v661_v42 = vcombine.low %v605_v38, %v637_v41  ;;  %v662_v43 = vcombine.high %v605_v38, %v637_v41 }
 0x1d8   : > { %v663_v52 = vcombine.low %v612_v48, %v644_v49  ;;  %v664_v53 = vcombine.high %v612_v48, %v644_v49 }
 0x1d9   : > { %v737_v46 = vpack.c.bf16 %v661_v42, %v661_v42  ;;  %v738_v47 = vpack.c.bf16 %v662_v43, %v662_v43 }
 0x1da   : > { %v739_v54 = vpack.c.bf16 %v663_v52, %v663_v52  ;;  %v740_v55 = vpack.c.bf16 %v664_v53, %v664_v53 }
 0x1db   : > { %1568 = vmatmul.mubr.msk.bf16.vlgmr.msra.gmra.mrb[0].mxu1 %vm745_vm2, %v737_v46  ;;  %1574 = vmatmul.mubr.msk.bf16.vlgmr.msra.gmra.mrb[4].mxu0 %vm745_vm2, %v738_v47 }
 0x1dc   : > { %1578 = vmatpush3.bf16.xpose.msra.mxu1 %v842_v50  ;;  %1584 = vmatpush3.bf16.xpose.msra.mxu0 %v888_v51 }
 0x1dd   : > { %1579 = vmatprep.mubr.msk.bf16.mxu1 %vm1888_vm0, %v1887_v0  ;;  %1585 = vmatprep.mubr.msk.bf16.mxu0 %vm1888_vm0, %v1887_v0 }
 0x1de   : > { %1589 = vmatprep.subr.bf16.mxu1 %v1887_v0  ;;  %1595 = vmatprep.subr.bf16.mxu0 %v1887_v0 }
 0x1e3   : > { %1580 = vmatmul.mubr.msk.bf16.vlgmr.msra.gmra.mrb[4].mxu1 %vm745_vm2, %v739_v54  ;;  %1586 = vmatmul.mubr.msk.bf16.vlgmr.msra.gmra.mrb[8].mxu0 %vm745_vm2, %v740_v55 }
 0x1e4   : > { %1591 = vmatprep.mubr.msk.bf16.mxu1 %vm1888_vm0, %v1887_v0  ;;  %1597 = vmatprep.mubr.msk.bf16.mxu0 %vm1888_vm0, %v1887_v0 }
 0x2ae   : > { %v786_v57 = vpop.f32.mrb[0].mxu1  ;;  %v832_v58 = vpop.f32.mrb[4].mxu0 }
 0x2af   : > { %v930_v59 = vmul.f32 0.35355338, %v786_v57  ;;  %v931_v60 = vmul.f32 0.35355338, %v832_v58  ;;  %v1569_v61 = vpop.f32.mrb[1].mxu1  ;;  %v1575_v62 = vpop.f32.mrb[5].mxu0 }
 0x2b0   : > { %v789_v63 = vpop.f32.mrb[2].mxu1  ;;  %v835_v1 = vpop.f32.mrb[6].mxu0 }
 0x2b1   : > { %v1570_v2 = vpop.f32.mrb[3].mxu1  ;;  %v1576_v3 = vpop.f32.mrb[7].mxu0  ;;  %v941_v4 = vsel %vm938_vm3, %v930_v59, -1e+30  ;;  %v942_v5 = vsel %vm938_vm3, %v931_v60, -1e+30 }
 0x2b2   : > { %v945_v15 = vsel %vm745_vm2, %v941_v4, -inf  ;;  %v948_v6 = vsel %vm745_vm2, %v942_v5, -inf }
 0x2b3   : > { %946 = vmax.xlane.f32.xlu1 %v945_v15  ;;  %949 = vmax.xlane.f32.xlu0 %v948_v6 }
 0x2b6   : > { %v878_v7 = vpop.f32.mrb[4].mxu1  ;;  %v924_v8 = vpop.f32.mrb[8].mxu0 }
 0x2b7   : > { %v932_v10 = vmul.f32 0.35355338, %v878_v7  ;;  %v933_v11 = vmul.f32 0.35355338, %v924_v8  ;;  %v1581_v12 = vpop.f32.mrb[5].mxu1  ;;  %v1587_v13 = vpop.f32.mrb[9].mxu0 }
 0x2b8   : > { %v881_v14 = vpop.f32.mrb[6].mxu1  ;;  %v927_v16 = vpop.f32.mrb[10].mxu0 }
 0x2b9   : > { %v1582_v17 = vpop.f32.mrb[7].mxu1  ;;  %v1588_v18 = vpop.f32.mrb[11].mxu0  ;;  %v943_v20 = vsel %vm938_vm3, %v932_v10, -1e+30  ;;  %v944_v21 = vsel %vm938_vm3, %v933_v11, -1e+30 }
 0x2ba   : > { %v951_v22 = vsel %vm745_vm2, %v943_v20, -inf  ;;  %v954_v24 = vsel %vm745_vm2, %v944_v21, -inf }
 0x2bb   : > { %952 = vmax.xlane.f32.xlu0 %v951_v22  ;;  %955 = vmax.xlane.f32.xlu1 %v954_v24 }
 0x2cc   : > { %320 = vrot.lane.b32.xlu1 %v2125_v9, %s1898_s10  ;;  %s1810_s10 = scalar_lea.vmem %s2298_s30, 128 }
 0x2cd   : > { %p1811_p11 = scmp.ne.s32.totalorder %s2298_s30, %s1810_s10 }
 0x2cf   : > { %p1812_p1 = pnand %p1811_p11, %p2358_p0 }
 0x2d1   : > { %317 = vrot.lane.b32.xlu0 %v2125_v9, %s1899_s24  ;;  %p1813_p3 = pneg %p1812_p1  ;;  %s1814_s24 = sshll.u32 %s1905_s25, 4  ;;  %s1815_s24 = int_to_ptr.vmem [resolvable:$false] %s1814_s24 }
 0x2d2   : > { %p1817_p7 = scmp.lt.s32.totalorder %s2298_s30, %s1815_s24 }
 0x340   : > { %v947_v25 = vpop.xlane.xlu1 %946  ;;  %v950_v26 = vpop.xlane.xlu0 %949 }
 0x341   : > { %v957_v27 = vsub.f32 %v941_v4, %v947_v25  ;;  %v958_v28 = vsub.f32 %v942_v5, %v950_v26 }
 0x343   : > { %v961_v29 = vmul.f32 1.442695, %v957_v27  ;;  %v963_v31 = vmul.f32 1.442695, %v958_v28 }
 0x345   : > { %1708 = vpow2.f32 %v961_v29 }
 0x346   : > { %1710 = vpow2.f32 %v963_v31 }
 0x348   : > { %v956_v35 = vpop.xlane.xlu1 %955  ;;  %v953_v36 = vpop.xlane.xlu0 %952 }
 0x349   : > { %v960_v37 = vsub.f32 %v944_v21, %v956_v35  ;;  %v959_v38 = vsub.f32 %v943_v20, %v953_v36 }
 0x34b   : > { %v967_v39 = vmul.f32 1.442695, %v960_v37  ;;  %v965_v40 = vmul.f32 1.442695, %v959_v38 }
 0x34c   : > { %v321_v45 = vpop.permute.xlu1 %320 }
 0x34d   : > { %1712 = vpow2.f32 %v967_v39 }
 0x34e   : > { %1714 = vpow2.f32 %v965_v40 }
 0x34f   : > { %v2213_v19 = vpop.eup %1708 }
 0x350   : > { %v2215_v32 = vpop.eup %1710  ;;  %v969_v33 = vsel %vm745_vm2, %v2213_v19, 0.0 }
 0x351   : > { %970 = vadd.xlane.f32.xlu0 %v969_v33  ;;  %v972_v34 = vsel %vm745_vm2, %v2215_v32, 0.0 }
 0x352   : > { %973 = vadd.xlane.f32.xlu1 %v972_v34 }
 0x357   : > { %v2223_v41 = vpop.eup %1712 }
 0x358   : > { %v2225_v42 = vpop.eup %1714  ;;  %v978_v43 = vsel %vm745_vm2, %v2223_v41, 0.0 }
 0x359   : > { %v975_v44 = vsel %vm745_vm2, %v2225_v42, 0.0 }
 0x363   : > { %323 = vrot.lane.b32.xlu1 %v2125_v9, %s1900_s20  ;;  %s1816_s20 = scalar_lea.vmem %s1815_s24, 256 }
 0x364   : > { %p1818_p9 = scmp.lt.s32.totalorder %s1816_s20, %s1810_s10 }
 0x366   : > { %p1819_p12 = por %p1818_p9, %p1817_p7 }
 0x367   : > { %326 = vrot.lane.b32.xlu0 %v2125_v9, %s1901_s28  ;;  %v318_v9 = vpop.permute.xlu0 %317 }
 0x368   : > { %p1820_p2 = pnand %p1819_p12, %p1813_p3 }
 0x386   : > { %979 = vadd.xlane.f32.xlu0 %v978_v43 }
 0x387   : > { %976 = vadd.xlane.f32.xlu1 %v975_v44 }
 0x3de   : > { %v971_v46 = vpop.xlane.xlu0 %970 }
 0x3df   : > { %v974_v47 = vpop.xlane.xlu1 %973  ;;  %1716 = vrcp.f32 %v971_v46 }
 0x3e0   : > { %1718 = vrcp.f32 %v974_v47 }
 0x3e2   : > { %v327_v48 = vpop.permute.xlu0 %326 }
 0x3e3   : > { %v481_v49 = vcombine.low %v321_v45, %v327_v48  ;;  %v482_v50 = vcombine.high %v321_v45, %v327_v48  ;;  %v324_v51 = vpop.permute.xlu1 %323 }
 0x3e4   : > { %v465_v52 = vcombine.low %v318_v9, %v324_v51  ;;  %v466_v53 = vcombine.high %v318_v9, %v324_v51 }
 0x3e5   : > { %v489_v54 = vrot.slane %v481_v49, %v2138_v23  ;;  %v496_v55 = vrot.slane %v482_v50, %v2138_v23 }
 0x3e6   : > { %v473_v56 = vrot.slane %v465_v52, %v2138_v23  ;;  %v480_v57 = vrot.slane %v466_v53, %v2138_v23 }
 0x3e8   : > { %v497_v58 = vcombine.low %v473_v56, %v489_v54  ;;  %v498_v59 = vcombine.high %v473_v56, %v489_v54  ;;  %v513_v60 = vcombine.low %v480_v57, %v496_v55  ;;  %v514_v61 = vcombine.high %v480_v57, %v496_v55 }
 0x3e9   : > { %v1717_v18 = vpop.eup %1716 }
 0x3ea   : > { %v505_v62 = vrot.slane %v497_v58, %v2141_v30  ;;  %v512_v63 = vrot.slane %v498_v59, %v2141_v30  ;;  %v521_v1 = vrot.slane %v513_v60, %v2141_v30  ;;  %v528_v2 = vrot.slane %v514_v61, %v2141_v30  ;;  %v1719_v22 = vpop.eup %1718 }
 0x3eb   : > { %v982_v28 = vmul.f32 %v1717_v18, %v2213_v19  ;;  %v984_v29 = vmul.f32 %v1719_v22, %v2215_v32  ;;  %v1339_v22 = vld [vmem:[#allocation7 + $0x18] sm:$0xff] }
 0x3ec   : > { %v669_v3 = vcombine.low %v505_v62, %v512_v63  ;;  %v1517_v4 = vcombine.high %v505_v62, %v512_v63  ;;  %v685_v5 = vcombine.low %v521_v1, %v528_v2  ;;  %v1518_v15 = vcombine.high %v521_v1, %v528_v2 }
 0x3ed   : > { %v989_v38 = vpack.c.bf16 %v982_v28, %v982_v28  ;;  %v990_v39 = vpack.c.bf16 %v984_v29, %v984_v29 }
 0x3ee   : > { %v676_v6 = vrot.slane %v669_v3, %v2138_v23  ;;  %v684_v7 = vrot.slane %v1517_v4, %v2138_v23  ;;  %v692_v8 = vrot.slane %v685_v5, %v2138_v23  ;;  %v700_v10 = vrot.slane %v1518_v15, %v2138_v23 }
 0x3f0   : > { %v701_v11 = vcombine.low %v676_v6, %v684_v7  ;;  %v702_v12 = vcombine.high %v676_v6, %v684_v7  ;;  %v717_v13 = vcombine.low %v692_v8, %v700_v10  ;;  %v718_v14 = vcombine.high %v692_v8, %v700_v10  ;;  %v1336_v7 = vld [vmem:[#allocation7] sm:$0xff]  ;;  %v1337_v8 = vld [vmem:[#allocation7 + $0x8] sm:$0xff] }
 0x3f2   : > { %v709_v16 = vrot.slane %v701_v11, %v2141_v30  ;;  %v716_v17 = vrot.slane %v702_v12, %v2141_v30  ;;  %v725_v20 = vrot.slane %v717_v13, %v2141_v30  ;;  %v732_v21 = vrot.slane %v718_v14, %v2141_v30 }
 0x3f3   : > { %v1340_v14 = vpack.c.bf16 %v1337_v8, %v1336_v7 }
 0x3f4   : > { %v733_v24 = vcombine.low %v709_v16, %v725_v20  ;;  %v734_v25 = vcombine.high %v709_v16, %v725_v20  ;;  %v735_v26 = vcombine.low %v716_v17, %v732_v21  ;;  %v736_v27 = vcombine.high %v716_v17, %v732_v21  ;;  %v1338_v21 = vld [vmem:[#allocation7 + $0x10] sm:$0xff] }
 0x3f5   : > { %v1341_v28 = vpack.c.bf16 %v1339_v22, %v1338_v21 }
 0x3f6   : > { %v993_v31 = vpack.c.bf16 %v733_v24, %v733_v24  ;;  %v994_v33 = vpack.c.bf16 %v734_v25, %v734_v25  ;;  %v995_v36 = vpack.c.bf16 %v735_v26, %v735_v26  ;;  %v996_v37 = vpack.c.bf16 %v736_v27, %v736_v27 }
 0x3f8   : > { %v1002_v34 = vsel %vm1000_vm4, %v993_v31, 0  ;;  %v1048_v35 = vsel %vm1000_vm4, %v994_v33, 0  ;;  %v1094_v19 = vsel %vm1000_vm4, %v995_v36, 0  ;;  %v1140_v32 = vsel %vm1000_vm4, %v996_v37, 0 }
 0x3f9   : > { %1590 = vmatpush3.bf16.msra.mxu1 %v1002_v34  ;;  %1596 = vmatpush3.bf16.msra.mxu0 %v1048_v35 }
 0x3fa   : > { %1601 = vmatprep.subr.bf16.mxu1 %v1887_v0  ;;  %1607 = vmatprep.subr.bf16.mxu0 %v1887_v0 }
 0x3fc   : > { %1592 = vmatmul.mubr.msk.bf16.vlgmr.msra.gmra.mrb[8].mxu1 %vm745_vm2, %v989_v38  ;;  %1598 = vmatmul.mubr.msk.bf16.vlgmr.msra.gmra.mrb[12].mxu0 %vm745_vm2, %v990_v39 }
 0x3fd   : > { %1602 = vmatpush3.bf16.msra.mxu1 %v1094_v19  ;;  %1608 = vmatpush3.bf16.msra.mxu0 %v1140_v32 }
 0x3fe   : > { %1603 = vmatprep.mubr.msk.bf16.mxu1 %vm1888_vm0, %v1887_v0  ;;  %1609 = vmatprep.mubr.msk.bf16.mxu0 %vm1888_vm0, %v1887_v0 }
 0x3ff   : > { %1613 = vmatprep.subr.bf16.mxu1 %v1887_v0 }
 0x413   : > { %v980_v40 = vpop.xlane.xlu0 %979 }
 0x414   : > { %1720 = vrcp.f32 %v980_v40  ;;  %v977_v43 = vpop.xlane.xlu1 %976 }
 0x415   : > { %1722 = vrcp.f32 %v977_v43 }
 0x41e   : > { %v1721_v44 = vpop.eup %1720 }
 0x41f   : > { %v1723_v9 = vpop.eup %1722  ;;  %v988_v45 = vmul.f32 %v1721_v44, %v2223_v41 }
 0x420   : > { %v986_v46 = vmul.f32 %v1723_v9, %v2225_v42 }
 0x421   : > { %v992_v47 = vpack.c.bf16 %v988_v45, %v988_v45 }
 0x422   : > { %v991_v48 = vpack.c.bf16 %v986_v46, %v986_v46 }
 0x423   : > { %1610 = vmatmul.mubr.msk.bf16.vlgmr.msra.gmra.mrb[16].mxu0 %vm745_vm2, %v992_v47 }
 0x424   : > { %1604 = vmatmul.mubr.msk.bf16.vlgmr.msra.gmra.mrb[12].mxu1 %vm745_vm2, %v991_v48 }
 0x425   : > { %1617 = vmatprep.mubr.msk.bf16.mxu1 %vm1888_vm0, %v1887_v0  ;;  %1614 = vmatpush3.bf16.msra.mxu1 %v1340_v14 }
 0x426   : > { %1615 = vmatprep.subr.bf16.mxu1 %v1887_v0 }
 0x429   : > { %1616 = vmatpush3.bf16.msra.mxu1 %v1341_v28 }
 0x4cf   : > { %v1038_v49 = vpop.f32.mrb[8].mxu1  ;;  %v1084_v50 = vpop.f32.mrb[12].mxu0 }
 0x4d0   : > { %v1593_v51 = vpop.f32.mrb[9].mxu1  ;;  %v1599_v52 = vpop.f32.mrb[13].mxu0 }
 0x4d1   : > { %v1041_v53 = vpop.f32.mrb[10].mxu1  ;;  %v1087_v54 = vpop.f32.mrb[14].mxu0 }
 0x4d2   : > { %v1594_v55 = vpop.f32.mrb[11].mxu1  ;;  %v1600_v56 = vpop.f32.mrb[15].mxu0 }
 0x4f6   : > { %v1176_v41 = vpop.f32.mrb[16].mxu0 }
 0x4f7   : > { %v1130_v57 = vpop.f32.mrb[12].mxu1  ;;  %v1198_v42 = vcombine.low %v1084_v50, %v1176_v41  ;;  %v1199_v58 = vcombine.high %v1084_v50, %v1176_v41  ;;  %v1611_v59 = vpop.f32.mrb[17].mxu0  ;;  %v1529_v50 = vld [vmem:[%s2343_s3] ss:$0 sm:$0xff] }
 0x4f8   : > { %v1182_v60 = vcombine.low %v1038_v49, %v1130_v57  ;;  %v1183_v61 = vcombine.high %v1038_v49, %v1130_v57  ;;  %v1605_v62 = vpop.f32.mrb[13].mxu1  ;;  %v1179_v63 = vpop.f32.mrb[18].mxu0 }
 0x4f9   : > { %v1206_v1 = vrot.slane %v1198_v42, %v2138_v23  ;;  %v1213_v2 = vrot.slane %v1199_v58, %v2138_v23  ;;  %v1133_v3 = vpop.f32.mrb[14].mxu1  ;;  %v1612_v4 = vpop.f32.mrb[19].mxu0 }
 0x4fa   : > { %v1190_v5 = vrot.slane %v1182_v60, %v2138_v23  ;;  %v1197_v15 = vrot.slane %v1183_v61, %v2138_v23  ;;  %v1606_v6 = vpop.f32.mrb[15].mxu1 }
 0x4fc   : > { %v1214_v10 = vcombine.low %v1190_v5, %v1206_v1  ;;  %v1215_v11 = vcombine.high %v1190_v5, %v1206_v1  ;;  %v1230_v12 = vcombine.low %v1197_v15, %v1213_v2  ;;  %v1231_v13 = vcombine.high %v1197_v15, %v1213_v2 }
 0x4fe   : > { %v1222_v16 = vrot.slane %v1214_v10, %v2141_v30  ;;  %v1229_v17 = vrot.slane %v1215_v11, %v2141_v30  ;;  %v1238_v18 = vrot.slane %v1230_v12, %v2141_v30  ;;  %v1245_v20 = vrot.slane %v1231_v13, %v2141_v30 }
 0x500   : > { %v1250_v24 = vcombine.low %v1222_v16, %v1229_v17  ;;  %v1527_v25 = vcombine.high %v1222_v16, %v1229_v17  ;;  %v1266_v26 = vcombine.low %v1238_v18, %v1245_v20  ;;  %v1528_v27 = vcombine.high %v1238_v18, %v1245_v20 }
 0x502   : > { %v1257_v29 = vrot.slane %v1250_v24, %v2138_v23  ;;  %v1265_v31 = vrot.slane %v1527_v25, %v2138_v23  ;;  %v1273_v33 = vrot.slane %v1266_v26, %v2138_v23  ;;  %v1281_v34 = vrot.slane %v1528_v27, %v2138_v23 }
 0x504   : > { %v1283_v35 = vcombine.high %v1257_v29, %v1265_v31  ;;  %v1299_v36 = vcombine.high %v1273_v33, %v1281_v34  ;;  %v1282_v37 = vcombine.low %v1257_v29, %v1265_v31  ;;  %v1298_v38 = vcombine.low %v1273_v33, %v1281_v34 }
 0x506   : > { %v1297_v39 = vrot.slane %v1283_v35, %v2141_v30  ;;  %v1313_v19 = vrot.slane %v1299_v36, %v2141_v30  ;;  %v1290_v0 = vrot.slane %v1282_v37, %v2141_v30  ;;  %v1306_v32 = vrot.slane %v1298_v38, %v2141_v30 }
 0x508   : > { %v1316_v40 = vcombine.low %v1297_v39, %v1313_v19  ;;  %v1315_v43 = vcombine.high %v1290_v0, %v1306_v32  ;;  %v1317_v44 = vcombine.high %v1297_v39, %v1313_v19  ;;  %v1314_v9 = vcombine.low %v1290_v0, %v1306_v32 }
 0x50a   : > { %1323 = vrot.lane.b32.xlu1 %v1316_v40, %s1902_s11  ;;  %1319 = vrot.lane.b32.xlu0 %v1315_v43, %s1903_s12 }
 0x50e   : > { %1327 = vrot.lane.b32.xlu1 %v1317_v44, %s1904_s7 }
 0x57c   : > { %v1324_v23 = vpop.permute.xlu1 %1323  ;;  %v1320_v45 = vpop.permute.xlu0 %1319 }
 0x57d   : > { %v1330_v46 = vsel %vm745_vm2, %v1314_v9, %v1320_v45 }
 0x57e   : > { %v1332_v30 = vsel %vm1331_vm5, %v1330_v46, %v1324_v23 }
 0x580   : > { %v1328_v47 = vpop.permute.xlu1 %1327 }
 0x581   : > { %v1334_v48 = vsel %vm1333_vm6, %v1332_v30, %v1328_v47 }
 0x582   : > { %v1335_v49 = vpack.c.bf16 %v1334_v48, %v1334_v48 }
 0x584   : > { %1618 = vmatmul.mubr.msk.bf16.vlgmr.msra.gmra.mrb[16].mxu1 %vm251_vm1, %v1335_v49 }
 0x657   : > { %v1386_v51 = vpop.f32.mrb[16].mxu1 }
 0x658   : > { %v1387_v52 = vadd.f32 %v1529_v50, %v1386_v51  ;;  %v1619_v53 = vpop.f32.mrb[17].mxu1 }
 0x659   : > { %v1389_v54 = vpop.f32.mrb[18].mxu1 }
 0x65a   : > { %1392 = vst [vmem:[%s241_s27] sm:$0xff] %v1387_v52  ;;  %v1620_v55 = vpop.f32.mrb[19].mxu1 }
 0x65b   : > { %1823 = shalt.err (!%p1820_p2)
}
 0x65c   : > { %s1824_s29 = scalar_lea.hbm %s2296_s26, 128  ;;  %s1828_s12 = scalar_lea.hbm %s2344_s4, 256 }
 0x65d   : > { %p1825_p13 = scmp.ne.s32.totalorder %s2296_s26, %s1824_s29  ;;  %p1829_p4 = scmp.lt.u32.totalorder %s2296_s26, %s2344_s4 }
 0x65e   : > { %p1830_p5 = scmp.lt.u32.totalorder %s1828_s12, %s1824_s29  ;;  %p1832_p11 = scmp.lt.u32.totalorder %s1824_s29, %s2296_s26 }
 0x65f   : > { %p1826_p6 = pnand %p1825_p13, %p2358_p0 }
 0x660   : > { %p1831_p8 = por %p1830_p5, %p1829_p4 }
 0x661   : > { %p1827_p10 = pneg %p1826_p6 }
 0x662   : > { %p1833_p1 = por %p1832_p11, %p1831_p8 }
 0x664   : > { %p1834_p3 = pnand %p1833_p1, %p1827_p10 }
 0x666   : > { %1837 = shalt.err (!%p1834_p3)
}
 0x667   : > { %1631 = dma.vmem_to_hbm [thread:$0]  (%p2358_p0), %s2298_s30, 128, %s2296_s26, %s1394_s19  }
 0x668 PF: > { %s1419_s21 = sand.u32 1, %s1868_s15   ;;  %p2359_p7 = scmp.ne.s32.totalorder %s2349_s22, 0 }
 0x669   : > { %p2360_p9 = scmp.ge.s32.totalorder %s1880_s18, 2  ;;  %s1420_s23 = scalar_lea.sflag [#allocation4], %s1419_s21 }
 0x66b   : > { %p1645_p12 = pnand %p2360_p9, %p2359_p7 }
 0x66d   : > { %1863 = dma.done.wait (!%p1645_p12), %s1420_s23, 128  }
 0x66e   : > { %1865 = vsyncadd (!%p1645_p12), %s1420_s23, 4294967168  ;;  %p18_p2 = scmp.ge.s32.totalorder %s2041_s9, 4   ;;  %s2361_s15 = smov %s1872_s16 }
 0x66f   : > { %s2362_s16 = smov %s1876_s17  ;;  %s2363_s17 = smov %s2057_s14 }
 0x670   : > { %s2364_s18 = smov %s2041_s9  ;;  %20 = sbr.rel (!%p18_p2) target bundleno = 6 (0x6), region = 89 }
 0x677   :  { %1425 = vsyncpa [#allocation3], 1 }
 0x678   :  { %1427 = vsyncpa [#allocation3 + $0x1], 1 }
 0x679   :  { %1428 = vsyncpa [#allocation6], 1 }
 0x67a   :  { %1429 = vsyncpa [#allocation4], 1 }
 0x67b   :  { %1431 = vsyncpa [#allocation4 + $0x1], 1 }

</bundles_post_ra>
